<compile_context>
chip_gen: v5e
topology: v5e:2x2
jax: 0.10.0
libtpu: 0.0.40
codegen_flags: <defaults>
</compile_context>

<pallas_src>
import jax
import jax.numpy as jnp
from jax.experimental import pallas as pl
from jax.experimental.pallas import tpu as pltpu

IN_FEATURES = 300
OUT_FEATURES = 4
DEFAULT_TILE_B = 1024  # >=512 rows hits the HBM roofline plateau; VMEM-safe on v7x


def _round_up(n, m):
    return ((n + m - 1) // m) * m


def _linear_softmax_kernel(x_ref, w_ref, b_ref, o_ref):
    # Linear: (TILE_B, 300) @ (300, 4) + (1, 4), accumulated in f32 on the MXU.
    logits = jnp.dot(
        x_ref[...], w_ref[...], preferred_element_type=jnp.float32
    ) + b_ref[...]
    # Numerically stable softmax over dim=-1 (matches F.softmax).
    m = jnp.max(logits, axis=-1, keepdims=True)
    e = jnp.exp(logits - m)
    denom = jnp.sum(e, axis=-1, keepdims=True)
    # Exact reciprocal + VPU multiply instead of a divide.
    o_ref[...] = (e * pl.reciprocal(denom, approx=False)).astype(o_ref.dtype)


def net_forward(x, w, b, *, tile_b=DEFAULT_TILE_B):
    """x: (B, 300) or (300,) f32, w: (300, 4) f32, b: (4,) f32 -> (B, 4) / (4,)."""
    squeeze = x.ndim == 1
    if squeeze:
        x = x[None, :]
    B, K = x.shape
    assert K == IN_FEATURES and w.shape == (IN_FEATURES, OUT_FEATURES)

    # Batch tile: multiple of 8 sublanes, never (much) larger than the batch.
    tile_b = max(8, min(_round_up(tile_b, 8), _round_up(B, 8)))
    grid_b = pl.cdiv(B, tile_b)  # ragged last tile handled by Pallas masking

    b2d = b.reshape(1, OUT_FEATURES)

    out = pl.pallas_call(
        _linear_softmax_kernel,
        out_shape=jax.ShapeDtypeStruct((B, OUT_FEATURES), jnp.float32),
        grid_spec=pltpu.PrefetchScalarGridSpec(
            num_scalar_prefetch=0,
            grid=(grid_b,),
            in_specs=[
                # x: streamed batch tiles (double-buffered by the pipeline).
                # Last dim = 300 equals the full array dim -> no pad copy needed.
                pl.BlockSpec((tile_b, IN_FEATURES), lambda i: (i, 0)),
                # W, b: constant index map -> resident in VMEM across the grid.
                pl.BlockSpec((IN_FEATURES, OUT_FEATURES), lambda i: (0, 0)),
                pl.BlockSpec((1, OUT_FEATURES), lambda i: (0, 0)),
            ],
            out_specs=pl.BlockSpec((tile_b, OUT_FEATURES), lambda i: (i, 0)),
        ),
        compiler_params=pltpu.CompilerParams(
            # Batch axis is embarrassingly parallel (megacore on v7x).
            dimension_semantics=("parallel",),
        ),
        cost_estimate=pl.CostEstimate(
            flops=2 * B * IN_FEATURES * OUT_FEATURES,
            transcendentals=B * OUT_FEATURES,
            bytes_accessed=(
                B * IN_FEATURES * 4
                + IN_FEATURES * OUT_FEATURES * 4
                + B * OUT_FEATURES * 4
            ),
        ),
    )(x, w, b2d)
    if squeeze:
        out = out[0]
    return out


def init_params(key):
    # Mimic torch.nn.Linear default init: U(-1/sqrt(fan_in), 1/sqrt(fan_in)).
    kw, kb = jax.random.split(key)
    bound = 1.0 / jnp.sqrt(jnp.float32(IN_FEATURES))
    # Stored transposed relative to torch's (out, in) so the kernel does x @ W.
    w = jax.random.uniform(
        kw, (IN_FEATURES, OUT_FEATURES), jnp.float32, minval=-bound, maxval=bound
    )
    b = jax.random.uniform(
        kb, (OUT_FEATURES,), jnp.float32, minval=-bound, maxval=bound
    )
    return w, b


def _reference(x, w, b):
    return jax.nn.softmax(x @ w + b, axis=-1)


if __name__ == "__main__":
    key = jax.random.PRNGKey(0)
    k_x, k_p, k_x2, k_x3 = jax.random.split(key, 4)
    w, b = init_params(k_p)

    forward = jax.jit(net_forward, static_argnames=("tile_b",))

    # Small example consistent with the module: a batch of 300-d inputs.
    batch = 8
    x = jax.random.normal(k_x, (batch, IN_FEATURES), jnp.float32)
    out = jax.block_until_ready(forward(x, w, b))
    assert out.shape == (batch, OUT_FEATURES)
    assert bool(jnp.all(jnp.abs(jnp.sum(out, axis=-1) - 1.0) < 1e-5))
    assert bool(jnp.allclose(out, _reference(x, w, b), atol=2e-5, rtol=1e-4))

    # Multi-tile path with a ragged last tile (B not a multiple of tile_b).
    batch2 = 1040
    x2 = jax.random.normal(k_x2, (batch2, IN_FEATURES), jnp.float32)
    out2 = jax.block_until_ready(forward(x2, w, b, tile_b=512))
    assert out2.shape == (batch2, OUT_FEATURES)
    assert bool(jnp.allclose(out2, _reference(x2, w, b), atol=2e-5, rtol=1e-4))

    # Single-sample path, like the torch spec's x = torch.tensor(train_x[0]).
    x3 = jax.random.normal(k_x3, (IN_FEATURES,), jnp.float32)
    out3 = jax.block_until_ready(forward(x3, w, b))
    assert out3.shape == (OUT_FEATURES,)
    assert bool(jnp.allclose(out3, _reference(x3, w, b), atol=2e-5, rtol=1e-4))

    print("KERNEL_OK")
</pallas_src>

<mosaic_0001>
module attributes {stable_mosaic.version = 11 : i64} {
  func.func @_linear_softmax_kernel(%arg0: i32, %arg1: memref<8x300xf32, #tpu.memory_space<vmem>>, %arg2: memref<300x4xf32, #tpu.memory_space<vmem>>, %arg3: memref<1x4xf32, #tpu.memory_space<vmem>>, %arg4: memref<8x4xf32, #tpu.memory_space<vmem>>) attributes {dimension_semantics = [#tpu.dimension_semantics<parallel>], iteration_bounds = array<i64: 1>, scalar_prefetch = 0 : i64, scratch_operands = 0 : i64, tpu.core_type = #tpu.core_type<tc>, window_params = [{transform_indices = @transform_0, window_bounds = array<i64: 8, 300>}, {pipeline_mode = #tpu.pipeline_mode<synchronous>, transform_indices = @transform_1, window_bounds = array<i64: 300, 4>}, {pipeline_mode = #tpu.pipeline_mode<synchronous>, transform_indices = @transform_2, window_bounds = array<i64: 1, 4>}, {transform_indices = @transform_3, window_bounds = array<i64: 8, 4>}]} {
    %c0 = arith.constant 0 : index
    %c0_0 = arith.constant 0 : index
    %0 = vector.load %arg1[%c0, %c0_0] : memref<8x300xf32, #tpu.memory_space<vmem>>, vector<8x300xf32>
    %c0_1 = arith.constant 0 : index
    %c0_2 = arith.constant 0 : index
    %1 = vector.load %arg2[%c0_1, %c0_2] : memref<300x4xf32, #tpu.memory_space<vmem>>, vector<300x4xf32>
    %cst = arith.constant dense<0.000000e+00> : vector<8x4xf32>
    %2 = tpu.matmul %0, %1, %cst {dimension_numbers = #tpu.dot_dimension_numbers<[1], [0], [0], [1], [0, 0, 1, 1], [], []>} : vector<8x300xf32>, vector<300x4xf32>, vector<8x4xf32> -> vector<8x4xf32>
    %c0_3 = arith.constant 0 : index
    %c0_4 = arith.constant 0 : index
    %3 = vector.load %arg3[%c0_3, %c0_4] : memref<1x4xf32, #tpu.memory_space<vmem>>, vector<1x4xf32>
    %4 = vector.broadcast %3 : vector<1x4xf32> to vector<8x4xf32>
    %5 = arith.addf %2, %4 : vector<8x4xf32>
    %cst_5 = arith.constant dense<0xFF800000> : vector<8xf32>
    %6 = vector.multi_reduction <maximumf>, %5, %cst_5 [1] : vector<8x4xf32> to vector<8xf32>
    %7 = vector.shape_cast %6 : vector<8xf32> to vector<8x1xf32>
    %8 = vector.broadcast %7 : vector<8x1xf32> to vector<8x4xf32>
    %9 = arith.subf %5, %8 : vector<8x4xf32>
    %10 = math.exp %9 : vector<8x4xf32>
    %cst_6 = arith.constant dense<0.000000e+00> : vector<8xf32>
    %11 = vector.multi_reduction <add>, %10, %cst_6 [1] : vector<8x4xf32> to vector<8xf32>
    %12 = vector.shape_cast %11 : vector<8xf32> to vector<8x1xf32>
    %13 = tpu.reciprocal %12 : vector<8x1xf32> -> vector<8x1xf32>
    %14 = vector.broadcast %13 : vector<8x1xf32> to vector<8x4xf32>
    %15 = arith.mulf %10, %14 : vector<8x4xf32>
    %c0_7 = arith.constant 0 : index
    %c0_8 = arith.constant 0 : index
    %16 = vector.load %arg4[%c0_7, %c0_8] : memref<8x4xf32, #tpu.memory_space<vmem>>, vector<8x4xf32>
    tpu.vector_store %arg4[%c0_7, %c0_8], %15 {strides = array<i32>} : memref<8x4xf32, #tpu.memory_space<vmem>>, vector<8x4xf32>,
    return
  }
  func.func @transform_0(%arg0: i32) -> (i32, i32) {
    %c0_i32 = arith.constant 0 : i32
    %c0_i32_0 = arith.constant 0 : i32
    return %arg0, %c0_i32 : i32, i32
  }
  func.func @transform_1(%arg0: i32) -> (i32, i32) {
    %c0_i32 = arith.constant 0 : i32
    %c0_i32_0 = arith.constant 0 : i32
    %c0_i32_1 = arith.constant 0 : i32
    return %c0_i32, %c0_i32_0 : i32, i32
  }
  func.func @transform_2(%arg0: i32) -> (i32, i32) {
    %c0_i32 = arith.constant 0 : i32
    %c0_i32_0 = arith.constant 0 : i32
    %c0_i32_1 = arith.constant 0 : i32
    return %c0_i32, %c0_i32_0 : i32, i32
  }
  func.func @transform_3(%arg0: i32) -> (i32, i32) {
    %c0_i32 = arith.constant 0 : i32
    %c0_i32_0 = arith.constant 0 : i32
    return %arg0, %c0_i32 : i32, i32
  }
}

</mosaic_0001>

<bundles_post_ra>
// kernel: net_forward.1
= control target key start
LH: loop header
LB: loop body
LE: loop exit
PB: predicated region body
PF: predicated region fallthrough
CT: control target
= control target key end

     0   :  { %vm63_vm0 = vcmask 1043456   ;;  %vm59_vm1 = vcmask 359424   ;;  %vm127_vm2 = vcmask 31744   ;;  %s316_s1 = inlined_call_operand.vmem [shape: f32[300,4], index: 1, kind: input, shape index: {}]   ;;  %s317_s2 = inlined_call_operand.vmem [shape: f32[1,4], index: 2, kind: input, shape index: {}]   ;;  %s318_s0 = inlined_call_operand.vmem [shape: f32[8,300], index: 0, kind: input, shape index: {}]   ;;  %s319_s3 = inlined_call_operand.vmem [shape: f32[8,4], index: 3, kind: output, shape index: {}]  }
   0x1   :  { %v32_v0 = vld [vmem:[%s316_s1 + $0x78] sm:$0xff]  ;;  %v31_v1 = vld [vmem:[%s316_s1 + $0x70] sm:$0xff]  ;;  %v30_v4 = vld [vmem:[%s316_s1 + $0x68] sm:$0xff] }
   0x2   :  { %v48_v2 = vld [vmem:[%s316_s1 + $0xf8] sm:$0xff]  ;;  %67 = vmatpush.msra.mxu0 %v32_v0  ;;  %v47_v3 = vld [vmem:[%s316_s1 + $0xf0] sm:$0xff]  ;;  %v46_v5 = vld [vmem:[%s316_s1 + $0xe8] sm:$0xff] }
   0x3   :  { %87 = vmatpush.msra.mxu1 %v48_v2  ;;  %v29_v6 = vld [vmem:[%s316_s1 + $0x60] sm:$0xff]  ;;  %v28_v8 = vld [vmem:[%s316_s1 + $0x58] sm:$0xff]  ;;  %v54_v10 = vld [vmem:[%s316_s1 + $0x128] sm:$0xf] }
   0x4   :  { %68 = vmatpush.msra.mxu0 %v31_v1  ;;  %v45_v7 = vld [vmem:[%s316_s1 + $0xe0] sm:$0xff]  ;;  %v44_v9 = vld [vmem:[%s316_s1 + $0xd8] sm:$0xff]  ;;  %v27_v12 = vld [vmem:[%s316_s1 + $0x50] sm:$0xff]  ;;  %157 = vmatpush.msk.msra.mxu2 %vm63_vm0, %v54_v10 }
   0x5   :  { %88 = vmatpush.msra.mxu1 %v47_v3  ;;  %v53_v11 = vld [vmem:[%s316_s1 + $0x120] sm:$0xff]  ;;  %v43_v13 = vld [vmem:[%s316_s1 + $0xd0] sm:$0xff]  ;;  %v52_v14 = vld [vmem:[%s316_s1 + $0x118] sm:$0xff] }
   0x6   :  { %69 = vmatpush.msra.mxu0 %v30_v4  ;;  %v26_v15 = vld [vmem:[%s316_s1 + $0x48] sm:$0xff]  ;;  %118 = vmatpush.msra.mxu2 %v53_v11  ;;  %v51_v17 = vld [vmem:[%s316_s1 + $0x110] sm:$0xff]  ;;  %v25_v18 = vld [vmem:[%s316_s1 + $0x40] sm:$0xff] }
   0x7   :  { %89 = vmatpush.msra.mxu1 %v46_v5  ;;  %v42_v16 = vld [vmem:[%s316_s1 + $0xc8] sm:$0xff]  ;;  %v41_v19 = vld [vmem:[%s316_s1 + $0xc0] sm:$0xff]  ;;  %v24_v21 = vld [vmem:[%s316_s1 + $0x38] sm:$0xff] }
   0x8   :  { %70 = vmatpush.msra.mxu0 %v29_v6  ;;  %119 = vmatpush.msra.mxu2 %v52_v14  ;;  %v50_v20 = vld [vmem:[%s316_s1 + $0x108] sm:$0xff]  ;;  %v40_v22 = vld [vmem:[%s316_s1 + $0xb8] sm:$0xff]  ;;  %v49_v23 = vld [vmem:[%s316_s1 + $0x100] sm:$0xff] }
   0x9   :  { %90 = vmatpush.msra.mxu1 %v45_v7  ;;  %v23_v24 = vld [vmem:[%s316_s1 + $0x30] sm:$0xff]  ;;  %v22_v27 = vld [vmem:[%s316_s1 + $0x28] sm:$0xff]  ;;  %v21_v29 = vld [vmem:[%s316_s1 + $0x20] sm:$0xff] }
   0xa   :  { %71 = vmatpush.msra.mxu0 %v28_v8  ;;  %120 = vmatpush.msra.mxu2 %v51_v17  ;;  %v39_v25 = vld [vmem:[%s316_s1 + $0xb0] sm:$0xff]  ;;  %v38_v28 = vld [vmem:[%s316_s1 + $0xa8] sm:$0xff]  ;;  %v37_v30 = vld [vmem:[%s316_s1 + $0xa0] sm:$0xff] }
   0xb   :  { %91 = vmatpush.msra.mxu1 %v44_v9  ;;  %v16_v26 = vld [vmem:[%s318_s0 + $0x10] sm:$0xff]  ;;  %v20_v31 = vld [vmem:[%s316_s1 + $0x18] sm:$0xff]  ;;  %v18_v35 = vld [vmem:[%s316_s1 + $0x8] sm:$0xff] }
   0xc   :  { %72 = vmatpush.msra.mxu0 %v27_v12  ;;  %121 = vmatpush.msra.mxu2 %v50_v20  ;;  %v36_v32 = vld [vmem:[%s316_s1 + $0x98] sm:$0xff]  ;;  %v19_v33 = vld [vmem:[%s316_s1 + $0x10] sm:$0xff]  ;;  %v34_v36 = vld [vmem:[%s316_s1 + $0x88] sm:$0xff] }
   0xd   :  { %92 = vmatpush.msra.mxu1 %v43_v13  ;;  %v35_v34 = vld [vmem:[%s316_s1 + $0x90] sm:$0xff]  ;;  %v17_v37 = vld [vmem:[%s316_s1] sm:$0xff]  ;;  %v15_v40 = vld [vmem:[%s318_s0 + $0x8] sm:$0xff] }
   0xe   :  { %73 = vmatpush.msra.mxu0 %v26_v15  ;;  %122 = vmatpush.msra.mxu2 %v49_v23  ;;  %v33_v38 = vld [vmem:[%s316_s1 + $0x80] sm:$0xff] }
   0xf   :  { %93 = vmatpush.msra.mxu1 %v42_v16  ;;  %158 = vmatmul.msk.f32.vlgmr.msra.gmra.mxu2 %vm59_vm1, %v16_v26  ;;  %v14_v39 = vld [vmem:[%s318_s0] sm:$0xff] }
  0x10   :  { %74 = vmatpush.msra.mxu0 %v25_v18  ;;  %v159_v41 = vld [vmem:[%s317_s2] ss:$0 sm:$0xff] }
  0x11   :  { %94 = vmatpush.msra.mxu1 %v41_v19 }
  0x12   :  { %75 = vmatpush.msra.mxu0 %v24_v21 }
  0x13   :  { %95 = vmatpush.msra.mxu1 %v40_v22 }
  0x14   :  { %76 = vmatpush.msra.mxu0 %v23_v24 }
  0x15   :  { %96 = vmatpush.msra.mxu1 %v39_v25 }
  0x16   :  { %77 = vmatpush.msra.mxu0 %v22_v27 }
  0x17   :  { %97 = vmatpush.msra.mxu1 %v38_v28 }
  0x18   :  { %78 = vmatpush.msra.mxu0 %v21_v29 }
  0x19   :  { %98 = vmatpush.msra.mxu1 %v37_v30 }
  0x1a   :  { %79 = vmatpush.msra.mxu0 %v20_v31 }
  0x1b   :  { %99 = vmatpush.msra.mxu1 %v36_v32 }
  0x1c   :  { %80 = vmatpush.msra.mxu0 %v19_v33 }
  0x1d   :  { %100 = vmatpush.msra.mxu1 %v35_v34 }
  0x1e   :  { %81 = vmatpush.msra.mxu0 %v18_v35 }
  0x1f   :  { %101 = vmatpush.msra.mxu1 %v34_v36 }
  0x20   :  { %82 = vmatpush.msra.mxu0 %v17_v37 }
  0x21   :  { %102 = vmatpush.msra.mxu1 %v33_v38  ;;  %83 = vmatmul.f32.vlgmr.msra.gmra.mxu0 %v14_v39 }
  0x22   :  { %103 = vmatmul.f32.vlgmr.msra.gmra.mxu1 %v15_v40 }
  0x92   :  { %v124_v45 = vpop.f32.mrf.mxu2 }
  0x9e   :  { %v84_v42 = vpop.f32.mrf.mxu0 }
  0x9f   :  { %v104_v43 = vpop.f32.mrf.mxu1  ;;  %v85_v44 = vadd.f32 %v159_v41, %v84_v42 }
  0xa1   :  { %v105_v46 = vadd.f32 %v104_v43, %v85_v44 }
  0xa3   :  { %v125_v47 = vadd.f32 %v124_v45, %v105_v46 }
  0xa5   :  { %v128_v48 = vsel %vm127_vm2, %v125_v47, -inf }
  0xa6   :  { %129 = vmax.xlane.f32.xlu0 %v128_v48 }
 0x119   :  { %v130_v49 = vpop.xlane.xlu0 %129 }
 0x11a   :  { %v131_v50 = vsub.f32 %v125_v47, %v130_v49 }
 0x11c   :  { %v132_v51 = vmul.f32 1.442695, %v131_v50 }
 0x11e   :  { %160 = vpow2.f32 %v132_v51 }
 0x124   :  { %v161_v52 = vpop.eup %160 }
 0x125   :  { %v134_v53 = vsel %vm127_vm2, %v161_v52, 0.0 }
 0x126   :  { %135 = vadd.xlane.f32.xlu0 %v134_v53 }
 0x199   :  { %v136_v54 = vpop.xlane.xlu0 %135 }
 0x19a   :  { %162 = vrcp.f32 %v136_v54  ;;  %v148_v58 = vand.u32 2147483648, %v136_v54  ;;  %v146_v60 = vand.u32 2147483647, %v136_v54  ;;  %vm142_vm4 = vweird.f32 %v136_v54 }
 0x19c   :  { %v149_v62 = vor.u32 1.1754944e-38, %v148_v58  ;;  %vm147_vm6 = vcmp.eq.f32.partialorder %v146_v60, 8.507059e+37 }
 0x1a0   :  { %v163_v55 = vpop.eup %162 }
 0x1a1   :  { %v138_v56 = vmul.f32 %v163_v55, %v136_v54  ;;  %vm143_vm3 = vweird.f32 %v163_v55 }
 0x1a2   :  { %vm144_vm5 = vmor %vm142_vm4, %vm143_vm3 }
 0x1a3   :  { %v139_v57 = vsub.f32 1.0, %v138_v56 }
 0x1a5   :  { %v140_v59 = vmul.f32 %v163_v55, %v139_v57 }
 0x1a7   :  { %v141_v61 = vadd.f32 %v163_v55, %v140_v59 }
 0x1a9   :  { %v145_v63 = vsel %vm144_vm5, %v163_v55, %v141_v61 }
 0x1aa   :  { %v150_v0 = vsel %vm147_vm6, %v149_v62, %v145_v63 }
 0x1ab   :  { %v151_v1 = vmul.f32 %v161_v52, %v150_v0 }
 0x1ad   :  { %152 = vst.msk [vmem:[%s319_s3] sm:$0xff] %vm127_vm2, %v151_v1 }

</bundles_post_ra>
